<compile_context>
chip_gen: v5e
topology: v5e:2x2
jax: 0.10.0
libtpu: 0.0.40
codegen_flags: <defaults>
</compile_context>

<pallas_src>
import numpy as np
import jax
import jax.numpy as jnp
from jax.experimental import pallas as pl
from jax.experimental.pallas import tpu as pltpu


def _round_up(x: int, m: int) -> int:
    return (x + m - 1) // m * m


# ---------------------------------------------------------------------------
# 1) View.forward — recommended path: free metadata reshape, no kernel.
# ---------------------------------------------------------------------------
def view_flatten(x: jax.Array) -> jax.Array:
    """Equivalent of `input.view(input.size(0), -1)` — zero-cost in XLA."""
    return jnp.reshape(x, (x.shape[0], -1))


# ---------------------------------------------------------------------------
# 2) One-time (model-init) preparation of nn.Linear params for the fused
#    flatten+linear kernel. Done ONCE, outside the per-call wrapper.
#    w: (N, F) torch layout  ->  (Fp, Np) pre-transposed, lane-padded, bf16.
#    b: (N,)                 ->  (1, Np) f32.
# ---------------------------------------------------------------------------
def prepare_classifier_params(w: jax.Array, b: jax.Array,
                              *, compute_dtype=jnp.bfloat16):
    N, F = w.shape
    assert b.shape == (N,)
    Np = _round_up(N, 128)
    Fp = _round_up(F, 128)   # F is already a 128-multiple for VGG (F=512)
    w_t = jnp.zeros((Fp, Np), compute_dtype).at[:F, :N].set(
        w.T.astype(compute_dtype))
    b_p = jnp.zeros((1, Np), jnp.float32).at[0, :N].set(b.astype(jnp.float32))
    return w_t, b_p


# ---------------------------------------------------------------------------
# 3) Fused View + classifier Linear:  out = flatten(x) @ W^T + b
#    (torch nn.Linear semantics; W supplied pre-transposed/padded from init).
# ---------------------------------------------------------------------------
def _flatten_linear_kernel(x_ref, w_ref, b_ref, o_ref):
    k = pl.program_id(2)

    @pl.when(k == 0)
    def _():
        # f32 accumulator lives directly in the (resident) output block.
        o_ref[...] = jnp.broadcast_to(b_ref[...], o_ref.shape)

    # (tm, tk) @ (tk, tn) on the MXU — no in-kernel transpose.
    o_ref[...] += jnp.dot(x_ref[...], w_ref[...],
                          preferred_element_type=jnp.float32)


def flatten_linear(x: jax.Array, w_t_p: jax.Array, b_p: jax.Array,
                   n_out: int, *, tile_k: int = 2048, tile_n: int = 256,
                   out_dtype=None) -> jax.Array:
    """Fused `x.view(B, -1) @ W^T + b` as one Pallas matmul kernel.

    Args:
      x:      (B, ...) activation (e.g. NCHW feature map); flattened for free.
      w_t_p:  (Fp, Np) pre-transposed / padded / bf16 weight from
              `prepare_classifier_params` (built ONCE at model init).
      b_p:    (1, Np) f32 padded bias from `prepare_classifier_params`.
      n_out:  true number of classes N (unpadded).
    Tiling defaults (tile_n=256, tile_k=2048) target the v6e/v7x 256x256 MXU;
    on v5e the Np=128 classifier head naturally falls back to 128-wide tiles.
    """
    B = x.shape[0]
    F = int(np.prod(x.shape[1:]))
    Fp, Np = w_t_p.shape
    compute_dtype = w_t_p.dtype
    out_dtype = out_dtype or x.dtype
    assert F <= Fp and Fp - F < 128, (F, Fp)

    # The View: free metadata reshape; cast to the MXU compute dtype (bf16).
    x2 = jnp.reshape(x, (B, F)).astype(compute_dtype)
    if F != Fp:
        # Fallback only when F is not lane-aligned (never hit for VGG).
        x2 = jnp.zeros((B, Fp), compute_dtype).at[:, :F].set(x2)

    # M tiling: full-extent block when small (exempt from the (8,128) rule,
    # no activation padding); otherwise a divisor of B, padding only as a
    # last resort.
    if B <= 256:
        tm, Mp, xp = B, B, x2
    else:
        tm = next((t for t in (256, 128, 64, 32, 16, 8) if B % t == 0), None)
        if tm is None:
            tm = 128
            Mp = _round_up(B, tm)
            xp = jnp.zeros((Mp, Fp), compute_dtype).at[:B].set(x2)
        else:
            Mp, xp = B, x2

    # K tiling: largest 128-multiple divisor of Fp not exceeding tile_k
    # (keeps both operands un-padded along K — consistent reduction).
    tile_k = max(tile_k, 128)
    tk = max(t for t in range(128, min(tile_k, Fp) + 1, 128) if Fp % t == 0)

    # N tiling: 256 when it divides Np (v6e/v7x MXU width), else 128.
    tn = min(tile_n, Np)
    if Np % tn != 0:
        tn = 128

    grid = (Mp // tm, Np // tn, Fp // tk)
    # TODO(synk): for the tiny CIFAR head the M/N grid degenerates to (1,1);
    # a 2-way K split with per-core partial sums could use v7x's second TC,
    # but the 512x10 head is weight-HBM-bound so the win is marginal.

    out_p = pl.pallas_call(
        _flatten_linear_kernel,
        out_shape=jax.ShapeDtypeStruct((Mp, Np), jnp.float32),
        grid=grid,
        in_specs=[
            pl.BlockSpec((tm, tk), lambda i, j, k: (i, k)),   # flattened LHS
            pl.BlockSpec((tk, tn), lambda i, j, k: (k, j)),   # W^T (F, N)
            pl.BlockSpec((1, tn), lambda i, j, k: (0, j)),    # bias
        ],
        out_specs=pl.BlockSpec((tm, tn), lambda i, j, k: (i, j)),
        compiler_params=pltpu.CompilerParams(
            dimension_semantics=("parallel", "parallel", "arbitrary"),
        ),
    )(xp, w_t_p, b_p)

    out = out_p[:B, :n_out]
    return out if out.dtype == out_dtype else out.astype(out_dtype)


# ---------------------------------------------------------------------------
# 4) Optional: materializing copy of the flattened slab (only if the flat
#    tensor itself must be written to HBM).  Sublane/lane-dense layout;
#    ~2 MiB blocks fit all generations' scoped-VMEM defaults with double
#    buffering (raise to ~4 MiB on v7x for better roofline).
# ---------------------------------------------------------------------------
def _copy_kernel(x_ref, o_ref):
    o_ref[...] = x_ref[...]


def view_flatten_materialize(x: jax.Array,
                             *, target_block_bytes: int = 2 * 1024 * 1024
                             ) -> jax.Array:
    B = x.shape[0]
    F = int(np.prod(x.shape[1:]))
    total = B * F
    itemsize = jnp.dtype(x.dtype).itemsize

    slab = None
    for wl in (8192, 4096, 2048, 1024, 512, 256, 128):
        if total % wl == 0 and (total // wl) % 8 == 0:
            slab = (total // wl, wl)
            break

    if slab is not None:
        R, Wl = slab
        x2 = jnp.reshape(x, (R, Wl))                              # free
        rows_per_block = max(8, (target_block_bytes // (Wl * itemsize)) // 8 * 8)
        tr = min(R, rows_per_block)
        grid = (pl.cdiv(R, tr),)
        out = pl.pallas_call(
            _copy_kernel,
            out_shape=jax.ShapeDtypeStruct((R, Wl), x.dtype),
            grid=grid,
            in_specs=[pl.BlockSpec((tr, Wl), lambda i: (i, 0))],
            out_specs=pl.BlockSpec((tr, Wl), lambda i: (i, 0)),
            compiler_params=pltpu.CompilerParams(
                dimension_semantics=("parallel",)),
        )(x2)
        return jnp.reshape(out, (B, F))                           # free

    # Fallback: keep (B, F), largest 128-multiple lane tile under the budget.
    x2 = jnp.reshape(x, (B, F))
    max_lanes = max(128, (target_block_bytes // (max(B, 1) * itemsize)) // 128 * 128)
    tf = min(_round_up(F, 128), max_lanes)
    grid = (pl.cdiv(F, tf),)
    return pl.pallas_call(
        _copy_kernel,
        out_shape=jax.ShapeDtypeStruct((B, F), x.dtype),
        grid=grid,
        in_specs=[pl.BlockSpec((B, tf), lambda j: (0, j))],
        out_specs=pl.BlockSpec((B, tf), lambda j: (0, j)),
        compiler_params=pltpu.CompilerParams(
            dimension_semantics=("parallel",)),
    )(x2)


if __name__ == "__main__":
    key = jax.random.PRNGKey(0)
    kx, kw, kb = jax.random.split(key, 3)

    # Small NCHW input consistent with a CIFAR-style conv feature map.
    B, C, H, W = 2, 4, 16, 16
    num_classes = 10
    F = C * H * W

    x = jax.random.normal(kx, (B, C, H, W), dtype=jnp.float32)
    w = jax.random.normal(kw, (num_classes, F), dtype=jnp.float32) * 0.01
    b = jax.random.normal(kb, (num_classes,), dtype=jnp.float32)

    ref_flat = jnp.reshape(x, (B, -1))

    # 1) View semantics (zero-cost, recommended path).
    flat = view_flatten(x)
    assert flat.shape == (B, F) and flat.dtype == x.dtype
    np.testing.assert_array_equal(np.asarray(flat), np.asarray(ref_flat))

    # 2) Materializing copy (only if the flat slab must be written out).
    flat_mat = jax.block_until_ready(view_flatten_materialize(x))
    assert flat_mat.shape == (B, F) and flat_mat.dtype == x.dtype
    np.testing.assert_array_equal(np.asarray(flat_mat), np.asarray(ref_flat))

    # 3) Flatten fused into the classifier Linear.
    #    One-time init prep (model init, NOT per forward call).
    w_t_p, b_p = prepare_classifier_params(w, b, compute_dtype=jnp.bfloat16)

    out = jax.block_until_ready(flatten_linear(x, w_t_p, b_p, num_classes))
    assert out.shape == (B, num_classes) and out.dtype == x.dtype

    # Reference with the same bf16 compute dtype + f32 accumulation.
    x_bf = np.asarray(ref_flat.astype(jnp.bfloat16).astype(jnp.float32))
    w_bf = np.asarray(jnp.asarray(w).astype(jnp.bfloat16).astype(jnp.float32))
    ref_out = x_bf @ w_bf.T + np.asarray(b)
    np.testing.assert_allclose(np.asarray(out), ref_out, rtol=5e-3, atol=5e-3)

    print("KERNEL_OK")
</pallas_src>

<mosaic_0001>
module attributes {stable_mosaic.version = 11 : i64} {
  func.func @_copy_kernel(%arg0: i32, %arg1: memref<8x256xf32, #tpu.memory_space<vmem>>, %arg2: memref<8x256xf32, #tpu.memory_space<vmem>>) attributes {dimension_semantics = [#tpu.dimension_semantics<parallel>], iteration_bounds = array<i64: 1>, scalar_prefetch = 0 : i64, scratch_operands = 0 : i64, tpu.core_type = #tpu.core_type<tc>, window_params = [{transform_indices = @transform_0, window_bounds = array<i64: 8, 256>}, {transform_indices = @transform_1, window_bounds = array<i64: 8, 256>}]} {
    %c0 = arith.constant 0 : index
    %c0_0 = arith.constant 0 : index
    %0 = vector.load %arg1[%c0, %c0_0] : memref<8x256xf32, #tpu.memory_space<vmem>>, vector<8x256xf32>
    %c0_1 = arith.constant 0 : index
    %c0_2 = arith.constant 0 : index
    %1 = vector.load %arg2[%c0_1, %c0_2] : memref<8x256xf32, #tpu.memory_space<vmem>>, vector<8x256xf32>
    tpu.vector_store %arg2[%c0_1, %c0_2], %0 {strides = array<i32>} : memref<8x256xf32, #tpu.memory_space<vmem>>, vector<8x256xf32>,
    return
  }
  func.func @transform_0(%arg0: i32) -> (i32, i32) {
    %c0_i32 = arith.constant 0 : i32
    %c0_i32_0 = arith.constant 0 : i32
    return %arg0, %c0_i32 : i32, i32
  }
  func.func @transform_1(%arg0: i32) -> (i32, i32) {
    %c0_i32 = arith.constant 0 : i32
    %c0_i32_0 = arith.constant 0 : i32
    return %arg0, %c0_i32 : i32, i32
  }
}

</mosaic_0001>

<bundles_post_ra>
// kernel: tpu_custom_call.1
= control target key start
LH: loop header
LB: loop body
LE: loop exit
PB: predicated region body
PF: predicated region fallthrough
CT: control target
= control target key end

     0   :  { %6 = vsyncpa [#allocation3], 0  ;;  %s116_s0 = inlined_call_operand.hbm [shape: f32[8,256], index: 0, kind: input, shape index: {}]   ;;  %s117_s1 = inlined_call_operand.hbm [shape: f32[8,256], index: 1, kind: output, shape index: {}]  }
   0x1   :  { %7 = vsyncpa [#allocation4], 0  ;;  %s13_s8 = sshll.u32 %s116_s0, 4  ;;  %s98_s9 = smov [#allocation2]   ;;  %s14_s8 = int_to_ptr.hbm [resolvable:$true] %s13_s8 }
   0x2   :  { %s15_s10 = sshll.u32 %s98_s9, 4  ;;  %s16_s10 = int_to_ptr.vmem [resolvable:$true] %s15_s10 }
   0x3   :  { %18 = dma.hbm_to_vmem [thread:$0]  %s14_s8, 256, %s16_s10, [#allocation3]  }
   0x4   :  { %94 = dma.done.wait [#allocation3], 256  }
   0x5   :  { %95 = vsyncadd [#allocation3], 4294967040  ;;  %s99_s11 = smov [#allocation5]   ;;  %s34_s15 = sshll.u32 %s117_s1, 4  ;;  %v23_v0 = vld [vmem:[#allocation2] sm:$0xff]  ;;  %v24_v1 = vld [vmem:[#allocation2 + $0x8] sm:$0xff]  ;;  %s35_s15 = int_to_ptr.hbm [resolvable:$true] %s34_s15 }
   0x6   :  { %s32_s12 = sshll.u32 %s99_s11, 4  ;;  %25 = vst [vmem:[#allocation5] sm:$0xff] %v23_v0  ;;  %s33_s12 = int_to_ptr.vmem [resolvable:$true] %s32_s12 }
   0x7   :  { %26 = vst [vmem:[#allocation5 + $0x8] sm:$0xff] %v24_v1 }
   0x8   :  { %37 = dma.vmem_to_hbm [thread:$0]  %s33_s12, 256, %s35_s15, [#allocation4]  }
   0x9   :  { %96 = dma.done.wait [#allocation4], 256  }
   0xa   :  { %97 = vsyncadd [#allocation4], 4294967040 }
   0xb   :  { %42 = vsyncpa [#allocation3], 1 }
   0xc   :  { %43 = vsyncpa [#allocation4], 1 }

</bundles_post_ra>
